<compile_context>
chip_gen: v7x
topology: tpu7x:2x2x1
jax: 0.10.0
libtpu: 0.0.40
codegen_flags: <defaults>
</compile_context>

<pallas_src>
import functools

import jax
import jax.numpy as jnp
from jax import lax
from jax.experimental import pallas as pl
from jax.experimental.pallas import tpu as pltpu


# ---------------------------------------------------------------------------
# Fused kernel: one batch element per grid step, all heads inside.
# ---------------------------------------------------------------------------
def _fused_attn_kernel(x_ref, wqkv_ref, wout_ref, bias_ref, y_ref, *,
                       heads, dim_head, scale):
    d = dim_head
    x = x_ref[0]                                     # (n, 2*dim) = [xr | xi]
    n = x.shape[0]

    # ---- qkv projection: one stacked real GEMM == complex GEMM (no bias) ----
    # wqkv_ref columns are pre-permuted to per-head blocks [wr_h | wi_h].
    w = jnp.dot(x, wqkv_ref[...], preferred_element_type=jnp.float32)  # (n, 2*inner)

    o_parts = []
    for h in range(heads):
        wcat = w[:, h * 2 * d:(h + 1) * 2 * d]       # (n, 2d) = [wr_h | wi_h]
        wrh = wcat[:, :d]
        wih = wcat[:, d:]

        # dots = (w @ w^H) * scale, real/imag stacked along rows:
        #   [[wr|wi], [wi|-wr]] @ [wr|wi]^T = [[dr], [di]] / scale
        qcat = jnp.concatenate(
            [wcat, jnp.concatenate([wih, -wrh], axis=1)], axis=0)      # (2n, 2d)
        dn = (((1,), (1,)), ((), ()))
        d_both = lax.dot_general(
            qcat, wcat, dn, preferred_element_type=jnp.float32) * scale  # (2n, n)
        dr = d_both[:n]
        di = d_both[n:]

        # ComplexSoftmax: softmax over |dots| along -1, re-apply the phase.
        # NOTE: dr*dr + di*di squares before the (r)sqrt; fine for O(1)
        # activations, would need a scaled formulation for huge |dots|.
        sq = dr * dr + di * di
        nz = sq > 0.0
        inv = lax.rsqrt(jnp.where(nz, sq, 1.0))      # EUP
        mag = sq * inv                               # |dots| (0 where dots == 0)
        mmax = jnp.max(mag, axis=-1, keepdims=True)
        e = jnp.exp(mag - mmax)                      # EUP
        p = e * pl.reciprocal(jnp.sum(e, axis=-1, keepdims=True), approx=True)
        ur = jnp.where(nz, dr * inv, 1.0)            # cos(angle); angle(0) := 0
        ui = jnp.where(nz, di * inv, 0.0)            # sin(angle)

        # out = attn @ w, both complex halves in a single matmul:
        #   [ar | ai] @ [[wr, wi], [-wi, wr]] = [or_h | oi_h]
        ph = jnp.concatenate([p * ur, p * ui], axis=1)                  # (n, 2n)
        vcat = jnp.concatenate(
            [wcat, jnp.concatenate([-wih, wrh], axis=1)], axis=0)       # (2n, 2d)
        o_parts.append(jnp.dot(ph, vcat, preferred_element_type=jnp.float32))

    # (n, 2*inner) in per-head [or_h | oi_h] layout; wout rows are permuted
    # host-side to match, so no in-kernel reshuffle is needed.
    o_all = jnp.concatenate(o_parts, axis=1)

    # ---- output projection (stacked complex GEMM) + bias ----
    y = jnp.dot(o_all, wout_ref[...], preferred_element_type=jnp.float32)
    y_ref[0] = y + bias_ref[...]


# ---------------------------------------------------------------------------
# Wrapper: host-side weight stacking / permutation + pallas_call.
# ---------------------------------------------------------------------------
def attention_forward(x, wqkv, wout, bout, *, heads):
    """x: (b, n, dim) complex64; wqkv: (inner, dim); wout: (dim, inner); bout: (dim,)."""
    b, n, dim = x.shape
    inner = wqkv.shape[0]
    d = inner // heads
    scale = float(d) ** -0.5
    f32 = jnp.float32

    x_stack = jnp.concatenate(
        [jnp.real(x).astype(f32), jnp.imag(x).astype(f32)], axis=-1)   # (b, n, 2*dim)

    def stack_weight(w_complex):
        # PyTorch Linear weight (out, in) -> stacked real (2*in, 2*out) so that
        # [xr | xi] @ W_stack = [yr | yi]  with  y = x @ W^T (complex).
        wr = jnp.real(w_complex).astype(f32).T
        wi = jnp.imag(w_complex).astype(f32).T
        return jnp.concatenate(
            [jnp.concatenate([wr, wi], axis=1),
             jnp.concatenate([-wi, wr], axis=1)], axis=0)

    # Per-head interleave permutation of the "2*inner" axis:
    # [re feat 0..inner-1 | im feat 0..inner-1] -> [re_h0|im_h0|re_h1|im_h1|...]
    perm = []
    for h in range(heads):
        perm += list(range(h * d, (h + 1) * d))
        perm += list(range(inner + h * d, inner + (h + 1) * d))
    perm = jnp.asarray(perm, dtype=jnp.int32)

    wqkv_stack = stack_weight(wqkv)[:, perm]         # (2*dim, 2*inner), per-head cols
    wout_stack = stack_weight(wout)[perm, :]         # (2*inner, 2*dim), per-head rows
    bias_stack = jnp.concatenate(
        [jnp.real(bout), jnp.imag(bout)]).astype(f32).reshape(1, 2 * dim)

    y_stack = pl.pallas_call(
        functools.partial(_fused_attn_kernel, heads=heads, dim_head=d, scale=scale),
        out_shape=jax.ShapeDtypeStruct((b, n, 2 * dim), f32),
        grid=(b,),
        in_specs=[
            pl.BlockSpec((1, n, 2 * dim), lambda bi: (bi, 0, 0)),
            pl.BlockSpec((2 * dim, 2 * inner), lambda bi: (0, 0)),
            pl.BlockSpec((2 * inner, 2 * dim), lambda bi: (0, 0)),
            pl.BlockSpec((1, 2 * dim), lambda bi: (0, 0)),
        ],
        out_specs=pl.BlockSpec((1, n, 2 * dim), lambda bi: (bi, 0, 0)),
        compiler_params=pltpu.CompilerParams(
            dimension_semantics=("parallel",)),
    )(x_stack, wqkv_stack, wout_stack, bias_stack)

    return jax.lax.complex(y_stack[..., :dim], y_stack[..., dim:])


# ---------------------------------------------------------------------------
if __name__ == "__main__":
    key = jax.random.PRNGKey(0)
    ks = jax.random.split(key, 8)

    b, n, dim = 2, 8, 32
    heads, dim_head = 4, 16
    inner = heads * dim_head

    def cnormal(kr, ki, shape, s=1.0):
        return jax.lax.complex(
            jax.random.normal(kr, shape, jnp.float32) * s,
            jax.random.normal(ki, shape, jnp.float32) * s)

    x = cnormal(ks[0], ks[1], (b, n, dim))
    wqkv = cnormal(ks[2], ks[3], (inner, dim), s=dim ** -0.5)
    wout = cnormal(ks[4], ks[5], (dim, inner), s=inner ** -0.5)
    bout = cnormal(ks[6], ks[7], (dim,), s=0.1)

    fwd = jax.jit(functools.partial(attention_forward, heads=heads))
    out = jax.block_until_ready(fwd(x, wqkv, wout, bout))

    # --- pure-JAX reference (complex64) ---
    scale = float(dim_head) ** -0.5
    w_ref = jnp.einsum('bnk,ik->bni', x, wqkv)
    w_ref = w_ref.reshape(b, n, heads, dim_head).transpose(0, 2, 1, 3)
    dots = jnp.einsum('bhnd,bhmd->bhnm', w_ref, jnp.conj(w_ref)) * scale
    mag = jnp.abs(dots)
    sm = jax.nn.softmax(mag, axis=-1)
    attn = (sm * jnp.exp(1j * jnp.angle(dots))).astype(jnp.complex64)
    o_ref = jnp.einsum('bhnm,bhmd->bhnd', attn, w_ref)
    o_ref = o_ref.transpose(0, 2, 1, 3).reshape(b, n, inner)
    ref = jnp.einsum('bni,oi->bno', o_ref, wout) + bout

    assert out.shape == ref.shape and out.dtype == ref.dtype
    # tolerance covers the EUP approx-reciprocal softmax normalization
    assert jnp.allclose(out, ref, atol=5e-3, rtol=5e-3), "mismatch vs reference"

    print("KERNEL_OK")
</pallas_src>

<mosaic_0001>
module attributes {stable_mosaic.version = 11 : i64} {
  func.func @_fused_attn_kernel(%arg0: i32, %arg1: memref<1x8x64xf32, #tpu.memory_space<vmem>>, %arg2: memref<64x128xf32, #tpu.memory_space<vmem>>, %arg3: memref<128x64xf32, #tpu.memory_space<vmem>>, %arg4: memref<1x64xf32, #tpu.memory_space<vmem>>, %arg5: memref<1x8x64xf32, #tpu.memory_space<vmem>>) attributes {dimension_semantics = [#tpu.dimension_semantics<parallel>], iteration_bounds = array<i64: 2>, scalar_prefetch = 0 : i64, scratch_operands = 0 : i64, tpu.core_type = #tpu.core_type<tc>, window_params = [{transform_indices = @transform_0, window_bounds = array<i64: 1, 8, 64>}, {pipeline_mode = #tpu.pipeline_mode<synchronous>, transform_indices = @transform_1, window_bounds = array<i64: 64, 128>}, {pipeline_mode = #tpu.pipeline_mode<synchronous>, transform_indices = @transform_2, window_bounds = array<i64: 128, 64>}, {pipeline_mode = #tpu.pipeline_mode<synchronous>, transform_indices = @transform_3, window_bounds = array<i64: 1, 64>}, {transform_indices = @transform_4, window_bounds = array<i64: 1, 8, 64>}]} {
    %c0 = arith.constant 0 : index
    %c0_0 = arith.constant 0 : index
    %c0_1 = arith.constant 0 : index
    %0 = vector.load %arg1[%c0, %c0_0, %c0_1] : memref<1x8x64xf32, #tpu.memory_space<vmem>>, vector<1x8x64xf32>
    %1 = vector.shape_cast %0 : vector<1x8x64xf32> to vector<8x64xf32>
    %c0_2 = arith.constant 0 : index
    %c0_3 = arith.constant 0 : index
    %2 = vector.load %arg2[%c0_2, %c0_3] : memref<64x128xf32, #tpu.memory_space<vmem>>, vector<64x128xf32>
    %cst = arith.constant dense<0.000000e+00> : vector<8x128xf32>
    %3 = tpu.matmul %1, %2, %cst {dimension_numbers = #tpu.dot_dimension_numbers<[1], [0], [0], [1], [0, 0, 1, 1], [], []>} : vector<8x64xf32>, vector<64x128xf32>, vector<8x128xf32> -> vector<8x128xf32>
    %4 = vector.extract_strided_slice %3 {offsets = [0, 0], sizes = [8, 32], strides = [1, 1]} : vector<8x128xf32> to vector<8x32xf32>
    %5 = vector.extract_strided_slice %4 {offsets = [0, 0], sizes = [8, 16], strides = [1, 1]} : vector<8x32xf32> to vector<8x16xf32>
    %6 = vector.extract_strided_slice %4 {offsets = [0, 16], sizes = [8, 16], strides = [1, 1]} : vector<8x32xf32> to vector<8x16xf32>
    %cst_4 = arith.constant 0.000000e+00 : f32
    %7 = vector.broadcast %cst_4 : f32 to vector<8x16xf32>
    %8 = arith.subf %7, %5 : vector<8x16xf32>
    %9 = tpu.concatenate %6, %8 in 1 : vector<8x16xf32>, vector<8x16xf32> -> vector<8x32xf32>
    %10 = tpu.concatenate %4, %9 in 0 : vector<8x32xf32>, vector<8x32xf32> -> vector<16x32xf32>
    %cst_5 = arith.constant dense<0.000000e+00> : vector<16x8xf32>
    %11 = tpu.matmul %10, %4, %cst_5 {dimension_numbers = #tpu.dot_dimension_numbers<[1], [1], [0], [0], [0, 0, 1, 0], [], []>} : vector<16x32xf32>, vector<8x32xf32>, vector<16x8xf32> -> vector<16x8xf32>
    %cst_6 = arith.constant 2.500000e-01 : f32
    %12 = vector.broadcast %cst_6 : f32 to vector<16x8xf32>
    %13 = arith.mulf %11, %12 : vector<16x8xf32>
    %14 = vector.extract_strided_slice %13 {offsets = [0, 0], sizes = [8, 8], strides = [1, 1]} : vector<16x8xf32> to vector<8x8xf32>
    %15 = vector.extract_strided_slice %13 {offsets = [8, 0], sizes = [8, 8], strides = [1, 1]} : vector<16x8xf32> to vector<8x8xf32>
    %16 = arith.mulf %14, %14 : vector<8x8xf32>
    %17 = arith.mulf %15, %15 : vector<8x8xf32>
    %18 = arith.addf %16, %17 : vector<8x8xf32>
    %cst_7 = arith.constant 0.000000e+00 : f32
    %19 = vector.broadcast %cst_7 : f32 to vector<8x8xf32>
    %20 = arith.cmpf ogt, %18, %19 : vector<8x8xf32>
    %cst_8 = arith.constant 1.000000e+00 : f32
    %21 = vector.broadcast %cst_8 : f32 to vector<8x8xf32>
    %22 = arith.select %20, %18, %21 : vector<8x8xi1>, vector<8x8xf32>
    %23 = math.rsqrt %22 : vector<8x8xf32>
    %24 = arith.mulf %18, %23 : vector<8x8xf32>
    %cst_9 = arith.constant dense<0xFF800000> : vector<8xf32>
    %25 = vector.multi_reduction <maximumf>, %24, %cst_9 [1] : vector<8x8xf32> to vector<8xf32>
    %26 = vector.shape_cast %25 : vector<8xf32> to vector<8x1xf32>
    %27 = vector.broadcast %26 : vector<8x1xf32> to vector<8x8xf32>
    %28 = arith.subf %24, %27 : vector<8x8xf32>
    %29 = math.exp %28 : vector<8x8xf32>
    %cst_10 = arith.constant dense<0.000000e+00> : vector<8xf32>
    %30 = vector.multi_reduction <add>, %29, %cst_10 [1] : vector<8x8xf32> to vector<8xf32>
    %31 = vector.shape_cast %30 : vector<8xf32> to vector<8x1xf32>
    %32 = tpu.reciprocal %31 {approx = true} : vector<8x1xf32> -> vector<8x1xf32>
    %33 = vector.broadcast %32 : vector<8x1xf32> to vector<8x8xf32>
    %34 = arith.mulf %29, %33 : vector<8x8xf32>
    %35 = arith.mulf %14, %23 : vector<8x8xf32>
    %cst_11 = arith.constant 1.000000e+00 : f32
    %36 = vector.broadcast %cst_11 : f32 to vector<8x8xf32>
    %37 = arith.select %20, %35, %36 : vector<8x8xi1>, vector<8x8xf32>
    %38 = arith.mulf %15, %23 : vector<8x8xf32>
    %cst_12 = arith.constant 0.000000e+00 : f32
    %39 = vector.broadcast %cst_12 : f32 to vector<8x8xf32>
    %40 = arith.select %20, %38, %39 : vector<8x8xi1>, vector<8x8xf32>
    %41 = arith.mulf %34, %37 : vector<8x8xf32>
    %42 = arith.mulf %34, %40 : vector<8x8xf32>
    %43 = tpu.concatenate %41, %42 in 1 : vector<8x8xf32>, vector<8x8xf32> -> vector<8x16xf32>
    %cst_13 = arith.constant 0.000000e+00 : f32
    %44 = vector.broadcast %cst_13 : f32 to vector<8x16xf32>
    %45 = arith.subf %44, %6 : vector<8x16xf32>
    %46 = tpu.concatenate %45, %5 in 1 : vector<8x16xf32>, vector<8x16xf32> -> vector<8x32xf32>
    %47 = tpu.concatenate %4, %46 in 0 : vector<8x32xf32>, vector<8x32xf32> -> vector<16x32xf32>
    %cst_14 = arith.constant dense<0.000000e+00> : vector<8x32xf32>
    %48 = tpu.matmul %43, %47, %cst_14 {dimension_numbers = #tpu.dot_dimension_numbers<[1], [0], [0], [1], [0, 0, 1, 1], [], []>} : vector<8x16xf32>, vector<16x32xf32>, vector<8x32xf32> -> vector<8x32xf32>
    %49 = vector.extract_strided_slice %3 {offsets = [0, 32], sizes = [8, 32], strides = [1, 1]} : vector<8x128xf32> to vector<8x32xf32>
    %50 = vector.extract_strided_slice %49 {offsets = [0, 0], sizes = [8, 16], strides = [1, 1]} : vector<8x32xf32> to vector<8x16xf32>
    %51 = vector.extract_strided_slice %49 {offsets = [0, 16], sizes = [8, 16], strides = [1, 1]} : vector<8x32xf32> to vector<8x16xf32>
    %cst_15 = arith.constant 0.000000e+00 : f32
    %52 = vector.broadcast %cst_15 : f32 to vector<8x16xf32>
    %53 = arith.subf %52, %50 : vector<8x16xf32>
    %54 = tpu.concatenate %51, %53 in 1 : vector<8x16xf32>, vector<8x16xf32> -> vector<8x32xf32>
    %55 = tpu.concatenate %49, %54 in 0 : vector<8x32xf32>, vector<8x32xf32> -> vector<16x32xf32>
    %cst_16 = arith.constant dense<0.000000e+00> : vector<16x8xf32>
    %56 = tpu.matmul %55, %49, %cst_16 {dimension_numbers = #tpu.dot_dimension_numbers<[1], [1], [0], [0], [0, 0, 1, 0], [], []>} : vector<16x32xf32>, vector<8x32xf32>, vector<16x8xf32> -> vector<16x8xf32>
    %cst_17 = arith.constant 2.500000e-01 : f32
    %57 = vector.broadcast %cst_17 : f32 to vector<16x8xf32>
    %58 = arith.mulf %56, %57 : vector<16x8xf32>
    %59 = vector.extract_strided_slice %58 {offsets = [0, 0], sizes = [8, 8], strides = [1, 1]} : vector<16x8xf32> to vector<8x8xf32>
    %60 = vector.extract_strided_slice %58 {offsets = [8, 0], sizes = [8, 8], strides = [1, 1]} : vector<16x8xf32> to vector<8x8xf32>
    %61 = arith.mulf %59, %59 : vector<8x8xf32>
    %62 = arith.mulf %60, %60 : vector<8x8xf32>
    %63 = arith.addf %61, %62 : vector<8x8xf32>
    %cst_18 = arith.constant 0.000000e+00 : f32
    %64 = vector.broadcast %cst_18 : f32 to vector<8x8xf32>
    %65 = arith.cmpf ogt, %63, %64 : vector<8x8xf32>
    %cst_19 = arith.constant 1.000000e+00 : f32
    %66 = vector.broadcast %cst_19 : f32 to vector<8x8xf32>
    %67 = arith.select %65, %63, %66 : vector<8x8xi1>, vector<8x8xf32>
    %68 = math.rsqrt %67 : vector<8x8xf32>
    %69 = arith.mulf %63, %68 : vector<8x8xf32>
    %cst_20 = arith.constant dense<0xFF800000> : vector<8xf32>
    %70 = vector.multi_reduction <maximumf>, %69, %cst_20 [1] : vector<8x8xf32> to vector<8xf32>
    %71 = vector.shape_cast %70 : vector<8xf32> to vector<8x1xf32>
    %72 = vector.broadcast %71 : vector<8x1xf32> to vector<8x8xf32>
    %73 = arith.subf %69, %72 : vector<8x8xf32>
    %74 = math.exp %73 : vector<8x8xf32>
    %cst_21 = arith.constant dense<0.000000e+00> : vector<8xf32>
    %75 = vector.multi_reduction <add>, %74, %cst_21 [1] : vector<8x8xf32> to vector<8xf32>
    %76 = vector.shape_cast %75 : vector<8xf32> to vector<8x1xf32>
    %77 = tpu.reciprocal %76 {approx = true} : vector<8x1xf32> -> vector<8x1xf32>
    %78 = vector.broadcast %77 : vector<8x1xf32> to vector<8x8xf32>
    %79 = arith.mulf %74, %78 : vector<8x8xf32>
    %80 = arith.mulf %59, %68 : vector<8x8xf32>
    %cst_22 = arith.constant 1.000000e+00 : f32
    %81 = vector.broadcast %cst_22 : f32 to vector<8x8xf32>
    %82 = arith.select %65, %80, %81 : vector<8x8xi1>, vector<8x8xf32>
    %83 = arith.mulf %60, %68 : vector<8x8xf32>
    %cst_23 = arith.constant 0.000000e+00 : f32
    %84 = vector.broadcast %cst_23 : f32 to vector<8x8xf32>
    %85 = arith.select %65, %83, %84 : vector<8x8xi1>, vector<8x8xf32>
    %86 = arith.mulf %79, %82 : vector<8x8xf32>
    %87 = arith.mulf %79, %85 : vector<8x8xf32>
    %88 = tpu.concatenate %86, %87 in 1 : vector<8x8xf32>, vector<8x8xf32> -> vector<8x16xf32>
    %cst_24 = arith.constant 0.000000e+00 : f32
    %89 = vector.broadcast %cst_24 : f32 to vector<8x16xf32>
    %90 = arith.subf %89, %51 : vector<8x16xf32>
    %91 = tpu.concatenate %90, %50 in 1 : vector<8x16xf32>, vector<8x16xf32> -> vector<8x32xf32>
    %92 = tpu.concatenate %49, %91 in 0 : vector<8x32xf32>, vector<8x32xf32> -> vector<16x32xf32>
    %cst_25 = arith.constant dense<0.000000e+00> : vector<8x32xf32>
    %93 = tpu.matmul %88, %92, %cst_25 {dimension_numbers = #tpu.dot_dimension_numbers<[1], [0], [0], [1], [0, 0, 1, 1], [], []>} : vector<8x16xf32>, vector<16x32xf32>, vector<8x32xf32> -> vector<8x32xf32>
    %94 = vector.extract_strided_slice %3 {offsets = [0, 64], sizes = [8, 32], strides = [1, 1]} : vector<8x128xf32> to vector<8x32xf32>
    %95 = vector.extract_strided_slice %94 {offsets = [0, 0], sizes = [8, 16], strides = [1, 1]} : vector<8x32xf32> to vector<8x16xf32>
    %96 = vector.extract_strided_slice %94 {offsets = [0, 16], sizes = [8, 16], strides = [1, 1]} : vector<8x32xf32> to vector<8x16xf32>
    %cst_26 = arith.constant 0.000000e+00 : f32
    %97 = vector.broadcast %cst_26 : f32 to vector<8x16xf32>
    %98 = arith.subf %97, %95 : vector<8x16xf32>
    %99 = tpu.concatenate %96, %98 in 1 : vector<8x16xf32>, vector<8x16xf32> -> vector<8x32xf32>
    %100 = tpu.concatenate %94, %99 in 0 : vector<8x32xf32>, vector<8x32xf32> -> vector<16x32xf32>
    %cst_27 = arith.constant dense<0.000000e+00> : vector<16x8xf32>
    %101 = tpu.matmul %100, %94, %cst_27 {dimension_numbers = #tpu.dot_dimension_numbers<[1], [1], [0], [0], [0, 0, 1, 0], [], []>} : vector<16x32xf32>, vector<8x32xf32>, vector<16x8xf32> -> vector<16x8xf32>
    %cst_28 = arith.constant 2.500000e-01 : f32
    %102 = vector.broadcast %cst_28 : f32 to vector<16x8xf32>
    %103 = arith.mulf %101, %102 : vector<16x8xf32>
    %104 = vector.extract_strided_slice %103 {offsets = [0, 0], sizes = [8, 8], strides = [1, 1]} : vector<16x8xf32> to vector<8x8xf32>
    %105 = vector.extract_strided_slice %103 {offsets = [8, 0], sizes = [8, 8], strides = [1, 1]} : vector<16x8xf32> to vector<8x8xf32>
    %106 = arith.mulf %104, %104 : vector<8x8xf32>
    %107 = arith.mulf %105, %105 : vector<8x8xf32>
    %108 = arith.addf %106, %107 : vector<8x8xf32>
    %cst_29 = arith.constant 0.000000e+00 : f32
    %109 = vector.broadcast %cst_29 : f32 to vector<8x8xf32>
    %110 = arith.cmpf ogt, %108, %109 : vector<8x8xf32>
    %cst_30 = arith.constant 1.000000e+00 : f32
    %111 = vector.broadcast %cst_30 : f32 to vector<8x8xf32>
    %112 = arith.select %110, %108, %111 : vector<8x8xi1>, vector<8x8xf32>
    %113 = math.rsqrt %112 : vector<8x8xf32>
    %114 = arith.mulf %108, %113 : vector<8x8xf32>
    %cst_31 = arith.constant dense<0xFF800000> : vector<8xf32>
    %115 = vector.multi_reduction <maximumf>, %114, %cst_31 [1] : vector<8x8xf32> to vector<8xf32>
    %116 = vector.shape_cast %115 : vector<8xf32> to vector<8x1xf32>
    %117 = vector.broadcast %116 : vector<8x1xf32> to vector<8x8xf32>
    %118 = arith.subf %114, %117 : vector<8x8xf32>
    %119 = math.exp %118 : vector<8x8xf32>
    %cst_32 = arith.constant dense<0.000000e+00> : vector<8xf32>
    %120 = vector.multi_reduction <add>, %119, %cst_32 [1] : vector<8x8xf32> to vector<8xf32>
    %121 = vector.shape_cast %120 : vector<8xf32> to vector<8x1xf32>
    %122 = tpu.reciprocal %121 {approx = true} : vector<8x1xf32> -> vector<8x1xf32>
    %123 = vector.broadcast %122 : vector<8x1xf32> to vector<8x8xf32>
    %124 = arith.mulf %119, %123 : vector<8x8xf32>
    %125 = arith.mulf %104, %113 : vector<8x8xf32>
    %cst_33 = arith.constant 1.000000e+00 : f32
    %126 = vector.broadcast %cst_33 : f32 to vector<8x8xf32>
    %127 = arith.select %110, %125, %126 : vector<8x8xi1>, vector<8x8xf32>
    %128 = arith.mulf %105, %113 : vector<8x8xf32>
    %cst_34 = arith.constant 0.000000e+00 : f32
    %129 = vector.broadcast %cst_34 : f32 to vector<8x8xf32>
    %130 = arith.select %110, %128, %129 : vector<8x8xi1>, vector<8x8xf32>
    %131 = arith.mulf %124, %127 : vector<8x8xf32>
    %132 = arith.mulf %124, %130 : vector<8x8xf32>
    %133 = tpu.concatenate %131, %132 in 1 : vector<8x8xf32>, vector<8x8xf32> -> vector<8x16xf32>
    %cst_35 = arith.constant 0.000000e+00 : f32
    %134 = vector.broadcast %cst_35 : f32 to vector<8x16xf32>
    %135 = arith.subf %134, %96 : vector<8x16xf32>
    %136 = tpu.concatenate %135, %95 in 1 : vector<8x16xf32>, vector<8x16xf32> -> vector<8x32xf32>
    %137 = tpu.concatenate %94, %136 in 0 : vector<8x32xf32>, vector<8x32xf32> -> vector<16x32xf32>
    %cst_36 = arith.constant dense<0.000000e+00> : vector<8x32xf32>
    %138 = tpu.matmul %133, %137, %cst_36 {dimension_numbers = #tpu.dot_dimension_numbers<[1], [0], [0], [1], [0, 0, 1, 1], [], []>} : vector<8x16xf32>, vector<16x32xf32>, vector<8x32xf32> -> vector<8x32xf32>
    %139 = vector.extract_strided_slice %3 {offsets = [0, 96], sizes = [8, 32], strides = [1, 1]} : vector<8x128xf32> to vector<8x32xf32>
    %140 = vector.extract_strided_slice %139 {offsets = [0, 0], sizes = [8, 16], strides = [1, 1]} : vector<8x32xf32> to vector<8x16xf32>
    %141 = vector.extract_strided_slice %139 {offsets = [0, 16], sizes = [8, 16], strides = [1, 1]} : vector<8x32xf32> to vector<8x16xf32>
    %cst_37 = arith.constant 0.000000e+00 : f32
    %142 = vector.broadcast %cst_37 : f32 to vector<8x16xf32>
    %143 = arith.subf %142, %140 : vector<8x16xf32>
    %144 = tpu.concatenate %141, %143 in 1 : vector<8x16xf32>, vector<8x16xf32> -> vector<8x32xf32>
    %145 = tpu.concatenate %139, %144 in 0 : vector<8x32xf32>, vector<8x32xf32> -> vector<16x32xf32>
    %cst_38 = arith.constant dense<0.000000e+00> : vector<16x8xf32>
    %146 = tpu.matmul %145, %139, %cst_38 {dimension_numbers = #tpu.dot_dimension_numbers<[1], [1], [0], [0], [0, 0, 1, 0], [], []>} : vector<16x32xf32>, vector<8x32xf32>, vector<16x8xf32> -> vector<16x8xf32>
    %cst_39 = arith.constant 2.500000e-01 : f32
    %147 = vector.broadcast %cst_39 : f32 to vector<16x8xf32>
    %148 = arith.mulf %146, %147 : vector<16x8xf32>
    %149 = vector.extract_strided_slice %148 {offsets = [0, 0], sizes = [8, 8], strides = [1, 1]} : vector<16x8xf32> to vector<8x8xf32>
    %150 = vector.extract_strided_slice %148 {offsets = [8, 0], sizes = [8, 8], strides = [1, 1]} : vector<16x8xf32> to vector<8x8xf32>
    %151 = arith.mulf %149, %149 : vector<8x8xf32>
    %152 = arith.mulf %150, %150 : vector<8x8xf32>
    %153 = arith.addf %151, %152 : vector<8x8xf32>
    %cst_40 = arith.constant 0.000000e+00 : f32
    %154 = vector.broadcast %cst_40 : f32 to vector<8x8xf32>
    %155 = arith.cmpf ogt, %153, %154 : vector<8x8xf32>
    %cst_41 = arith.constant 1.000000e+00 : f32
    %156 = vector.broadcast %cst_41 : f32 to vector<8x8xf32>
    %157 = arith.select %155, %153, %156 : vector<8x8xi1>, vector<8x8xf32>
    %158 = math.rsqrt %157 : vector<8x8xf32>
    %159 = arith.mulf %153, %158 : vector<8x8xf32>
    %cst_42 = arith.constant dense<0xFF800000> : vector<8xf32>
    %160 = vector.multi_reduction <maximumf>, %159, %cst_42 [1] : vector<8x8xf32> to vector<8xf32>
    %161 = vector.shape_cast %160 : vector<8xf32> to vector<8x1xf32>
    %162 = vector.broadcast %161 : vector<8x1xf32> to vector<8x8xf32>
    %163 = arith.subf %159, %162 : vector<8x8xf32>
    %164 = math.exp %163 : vector<8x8xf32>
    %cst_43 = arith.constant dense<0.000000e+00> : vector<8xf32>
    %165 = vector.multi_reduction <add>, %164, %cst_43 [1] : vector<8x8xf32> to vector<8xf32>
    %166 = vector.shape_cast %165 : vector<8xf32> to vector<8x1xf32>
    %167 = tpu.reciprocal %166 {approx = true} : vector<8x1xf32> -> vector<8x1xf32>
    %168 = vector.broadcast %167 : vector<8x1xf32> to vector<8x8xf32>
    %169 = arith.mulf %164, %168 : vector<8x8xf32>
    %170 = arith.mulf %149, %158 : vector<8x8xf32>
    %cst_44 = arith.constant 1.000000e+00 : f32
    %171 = vector.broadcast %cst_44 : f32 to vector<8x8xf32>
    %172 = arith.select %155, %170, %171 : vector<8x8xi1>, vector<8x8xf32>
    %173 = arith.mulf %150, %158 : vector<8x8xf32>
    %cst_45 = arith.constant 0.000000e+00 : f32
    %174 = vector.broadcast %cst_45 : f32 to vector<8x8xf32>
    %175 = arith.select %155, %173, %174 : vector<8x8xi1>, vector<8x8xf32>
    %176 = arith.mulf %169, %172 : vector<8x8xf32>
    %177 = arith.mulf %169, %175 : vector<8x8xf32>
    %178 = tpu.concatenate %176, %177 in 1 : vector<8x8xf32>, vector<8x8xf32> -> vector<8x16xf32>
    %cst_46 = arith.constant 0.000000e+00 : f32
    %179 = vector.broadcast %cst_46 : f32 to vector<8x16xf32>
    %180 = arith.subf %179, %141 : vector<8x16xf32>
    %181 = tpu.concatenate %180, %140 in 1 : vector<8x16xf32>, vector<8x16xf32> -> vector<8x32xf32>
    %182 = tpu.concatenate %139, %181 in 0 : vector<8x32xf32>, vector<8x32xf32> -> vector<16x32xf32>
    %cst_47 = arith.constant dense<0.000000e+00> : vector<8x32xf32>
    %183 = tpu.matmul %178, %182, %cst_47 {dimension_numbers = #tpu.dot_dimension_numbers<[1], [0], [0], [1], [0, 0, 1, 1], [], []>} : vector<8x16xf32>, vector<16x32xf32>, vector<8x32xf32> -> vector<8x32xf32>
    %184 = tpu.concatenate %48, %93, %138, %183 in 1 : vector<8x32xf32>, vector<8x32xf32>, vector<8x32xf32>, vector<8x32xf32> -> vector<8x128xf32>
    %c0_48 = arith.constant 0 : index
    %c0_49 = arith.constant 0 : index
    %185 = vector.load %arg3[%c0_48, %c0_49] : memref<128x64xf32, #tpu.memory_space<vmem>>, vector<128x64xf32>
    %cst_50 = arith.constant dense<0.000000e+00> : vector<8x64xf32>
    %186 = tpu.matmul %184, %185, %cst_50 {dimension_numbers = #tpu.dot_dimension_numbers<[1], [0], [0], [1], [0, 0, 1, 1], [], []>} : vector<8x128xf32>, vector<128x64xf32>, vector<8x64xf32> -> vector<8x64xf32>
    %c0_51 = arith.constant 0 : index
    %c0_52 = arith.constant 0 : index
    %187 = vector.load %arg4[%c0_51, %c0_52] : memref<1x64xf32, #tpu.memory_space<vmem>>, vector<1x64xf32>
    %188 = vector.broadcast %187 : vector<1x64xf32> to vector<8x64xf32>
    %189 = arith.addf %186, %188 : vector<8x64xf32>
    %c0_53 = arith.constant 0 : index
    %c0_54 = arith.constant 0 : index
    %c0_55 = arith.constant 0 : index
    %190 = vector.load %arg5[%c0_53, %c0_54, %c0_55] : memref<1x8x64xf32, #tpu.memory_space<vmem>>, vector<1x8x64xf32>
    %191 = vector.shape_cast %190 : vector<1x8x64xf32> to vector<8x64xf32>
    %192 = vector.shape_cast %189 : vector<8x64xf32> to vector<1x8x64xf32>
    tpu.vector_store %arg5[%c0_53, %c0_54, %c0_55], %192 {strides = array<i32>} : memref<1x8x64xf32, #tpu.memory_space<vmem>>, vector<1x8x64xf32>,
    return
  }
  func.func @transform_0(%arg0: i32) -> (i32, i32, i32) {
    %c0_i32 = arith.constant 0 : i32
    %c0_i32_0 = arith.constant 0 : i32
    %c0_i32_1 = arith.constant 0 : i32
    return %arg0, %c0_i32, %c0_i32_0 : i32, i32, i32
  }
  func.func @transform_1(%arg0: i32) -> (i32, i32) {
    %c0_i32 = arith.constant 0 : i32
    %c0_i32_0 = arith.constant 0 : i32
    %c0_i32_1 = arith.constant 0 : i32
    return %c0_i32, %c0_i32_0 : i32, i32
  }
  func.func @transform_2(%arg0: i32) -> (i32, i32) {
    %c0_i32 = arith.constant 0 : i32
    %c0_i32_0 = arith.constant 0 : i32
    %c0_i32_1 = arith.constant 0 : i32
    return %c0_i32, %c0_i32_0 : i32, i32
  }
  func.func @transform_3(%arg0: i32) -> (i32, i32) {
    %c0_i32 = arith.constant 0 : i32
    %c0_i32_0 = arith.constant 0 : i32
    %c0_i32_1 = arith.constant 0 : i32
    return %c0_i32, %c0_i32_0 : i32, i32
  }
  func.func @transform_4(%arg0: i32) -> (i32, i32, i32) {
    %c0_i32 = arith.constant 0 : i32
    %c0_i32_0 = arith.constant 0 : i32
    %c0_i32_1 = arith.constant 0 : i32
    return %arg0, %c0_i32, %c0_i32_0 : i32, i32, i32
  }
}

</mosaic_0001>

<bundles_post_ra>
// kernel: custom-call.2
= control target key start
LH: loop header
LB: loop body
LE: loop exit
PB: predicated region body
PF: predicated region fallthrough
CT: control target
= control target key end

     0   :  { %2 = vsyncpa [#allocation0], 0  ;;  %s61_s0 = inlined_call_operand.hbm [shape: c64[64,32], index: 0, kind: input, shape index: {}]   ;;  %s62_s1 = inlined_call_operand.vmem [shape: f32[64,32], index: 1, kind: output, shape index: {}]  }
   0x1   :  { %s3_s8 = sshll.u32 %s62_s1, 4  ;;  %s9_s11 = scalar_lea.hbm %s61_s0, 512  ;;  %s4_s8 = int_to_ptr.vmem [resolvable:$true] %s3_s8 }
   0x2   :  { %p10_p0 = scmp.ne.s32.totalorder %s61_s0, %s9_s11  ;;  %s11_s16 = scalar_lea.hbm %s61_s0, 1024 }
   0x3   :  { %p12_p1 = scmp.lt.u32.totalorder %s11_s16, %s9_s11  ;;  %p13_p2 = scmp.lt.u32.totalorder %s9_s11, %s61_s0 }
   0x5   :  { %p14_p3 = por %p13_p2, %p12_p1 }
   0x7   :  { %p15_p4 = pnand %p14_p3, %p10_p0 }
   0x9   :  { %18 = shalt.err (!%p15_p4)  }
   0xa   :  { %s19_s1 = scalar_lea.vmem %s4_s8, 512  ;;  %p24_p6 = scmp.lt.s32.totalorder %s4_s8, %s4_s8 }
   0xb   :  { %p20_p5 = scmp.ne.s32.totalorder %s4_s8, %s19_s1  ;;  %p25_p7 = scmp.lt.s32.totalorder %s19_s1, %s19_s1 }
   0xd   :  { %p26_p8 = por %p25_p7, %p24_p6 }
   0xf   :  { %p27_p9 = pnand %p26_p8, %p20_p5 }
  0x11   :  { %30 = shalt.err (!%p27_p9)  }
  0x12   :  { %6 = dma.hbm_to_vmem [thread:$0]  %s61_s0, 512, %s4_s8, [#allocation0] }
  0x13   :  { %31 = dma.done.wait [#allocation0], 512  }
  0x14   :  { %32 = vsyncadd [#allocation0], 4294966784 }
  0x15   :  { %8 = vsyncpa [#allocation0], 1 }

// kernel: custom-call.3
= control target key start
LH: loop header
LB: loop body
LE: loop exit
PB: predicated region body
PF: predicated region fallthrough
CT: control target
= control target key end

     0   :  { %s59_s0 = inlined_call_operand.hbm [shape: c64[64,32], index: 0, kind: input, shape index: {}]   ;;  %s60_s1 = inlined_call_operand.vmem [shape: f32[64,32], index: 1, kind: output, shape index: {}]  }
   0x1   :  { %s2_s8 = scalar_lea.hbm %s59_s0, 512 }
   0x2   :  { %3 = vsyncpa [#allocation0], 0  ;;  %s4_s11 = sshll.u32 %s60_s1, 4  ;;  %s34_s14 = scalar_lea.hbm %s59_s0, 1024  ;;  %s5_s11 = int_to_ptr.vmem [resolvable:$true] %s4_s11 }
   0x3   :  { %p11_p0 = scmp.ne.s32.totalorder %s2_s8, %s34_s14  ;;  %p13_p1 = scmp.lt.u32.totalorder %s2_s8, %s59_s0 }
   0x4   :  { %p14_p2 = scmp.lt.u32.totalorder %s34_s14, %s34_s14  ;;  %p16_p4 = scmp.lt.u32.totalorder %s34_s14, %s2_s8 }
   0x6   :  { %p15_p3 = por %p14_p2, %p13_p1 }
   0x8   :  { %p17_p5 = por %p16_p4, %p15_p3 }
   0xa   :  { %p18_p6 = pnand %p17_p5, %p11_p0 }
   0xc   :  { %21 = shalt.err (!%p18_p6)  }
   0xd   :  { %s22_s17 = scalar_lea.vmem %s5_s11, 512  ;;  %p27_p8 = scmp.lt.s32.totalorder %s5_s11, %s5_s11 }
   0xe   :  { %p23_p7 = scmp.ne.s32.totalorder %s5_s11, %s22_s17  ;;  %p28_p9 = scmp.lt.s32.totalorder %s22_s17, %s22_s17 }
  0x10   :  { %p29_p10 = por %p28_p9, %p27_p8 }
  0x12   :  { %p30_p11 = pnand %p29_p10, %p23_p7 }
  0x14   :  { %33 = shalt.err (!%p30_p11)  }
  0x15   :  { %7 = dma.hbm_to_vmem [thread:$0]  %s2_s8, 512, %s5_s11, [#allocation0] }
  0x16   :  { %35 = dma.done.wait [#allocation0], 512  }
  0x17   :  { %36 = vsyncadd [#allocation0], 4294966784 }
  0x18   :  { %9 = vsyncpa [#allocation0], 1 }

// kernel: custom-call.5
= control target key start
LH: loop header
LB: loop body
LE: loop exit
PB: predicated region body
PF: predicated region fallthrough
CT: control target
= control target key end

     0   :  { %s113_s0 = inlined_call_operand.vmem [shape: c64[32,64], index: 0, kind: input, shape index: {}]   ;;  %s114_s1 = inlined_call_operand.vmem [shape: f32[32,64], index: 1, kind: output, shape index: {}]  }
   0x1   :  { %v40_v0 = vld [vmem:[%s113_s0 + $0x40] sm:$0xff]  ;;  %v41_v1 = vld [vmem:[%s113_s0 + $0x48] sm:$0xff]  ;;  %v43_v2 = vld [vmem:[%s113_s0 + $0x50] sm:$0xff] }
   0x2   :  { %4 = vst [vmem:[%s114_s1] sm:$0xff] %v40_v0  ;;  %42 = vst [vmem:[%s114_s1 + $0x8] sm:$0xff] %v41_v1  ;;  %v45_v3 = vld [vmem:[%s113_s0 + $0x58] sm:$0xff]  ;;  %v47_v4 = vld [vmem:[%s113_s0 + $0x60] sm:$0xff] }
   0x3   :  { %44 = vst [vmem:[%s114_s1 + $0x10] sm:$0xff] %v43_v2  ;;  %v49_v5 = vld [vmem:[%s113_s0 + $0x68] sm:$0xff]  ;;  %46 = vst [vmem:[%s114_s1 + $0x18] sm:$0xff] %v45_v3  ;;  %v51_v6 = vld [vmem:[%s113_s0 + $0x70] sm:$0xff] }
   0x4   :  { %48 = vst [vmem:[%s114_s1 + $0x20] sm:$0xff] %v47_v4  ;;  %50 = vst [vmem:[%s114_s1 + $0x28] sm:$0xff] %v49_v5  ;;  %v53_v7 = vld [vmem:[%s113_s0 + $0x78] sm:$0xff] }
   0x5   :  { %52 = vst [vmem:[%s114_s1 + $0x30] sm:$0xff] %v51_v6  ;;  %54 = vst [vmem:[%s114_s1 + $0x38] sm:$0xff] %v53_v7 }

// kernel: custom-call.4
= control target key start
LH: loop header
LB: loop body
LE: loop exit
PB: predicated region body
PF: predicated region fallthrough
CT: control target
= control target key end

     0   :  { %s104_s0 = inlined_call_operand.vmem [shape: c64[32,64], index: 0, kind: input, shape index: {}]   ;;  %s105_s1 = inlined_call_operand.vmem [shape: f32[32,64], index: 1, kind: output, shape index: {}]  }
   0x1   :  { %v2_v0 = vld [vmem:[%s104_s0] sm:$0xff]  ;;  %v32_v1 = vld [vmem:[%s104_s0 + $0x8] sm:$0xff]  ;;  %v34_v2 = vld [vmem:[%s104_s0 + $0x10] sm:$0xff] }
   0x2   :  { %3 = vst [vmem:[%s105_s1] sm:$0xff] %v2_v0  ;;  %33 = vst [vmem:[%s105_s1 + $0x8] sm:$0xff] %v32_v1  ;;  %v36_v3 = vld [vmem:[%s104_s0 + $0x18] sm:$0xff]  ;;  %v38_v4 = vld [vmem:[%s104_s0 + $0x20] sm:$0xff] }
   0x3   :  { %35 = vst [vmem:[%s105_s1 + $0x10] sm:$0xff] %v34_v2  ;;  %v40_v5 = vld [vmem:[%s104_s0 + $0x28] sm:$0xff]  ;;  %37 = vst [vmem:[%s105_s1 + $0x18] sm:$0xff] %v36_v3  ;;  %v42_v6 = vld [vmem:[%s104_s0 + $0x30] sm:$0xff] }
   0x4   :  { %39 = vst [vmem:[%s105_s1 + $0x20] sm:$0xff] %v38_v4  ;;  %41 = vst [vmem:[%s105_s1 + $0x28] sm:$0xff] %v40_v5  ;;  %v44_v7 = vld [vmem:[%s104_s0 + $0x38] sm:$0xff] }
   0x5   :  { %43 = vst [vmem:[%s105_s1 + $0x30] sm:$0xff] %v42_v6  ;;  %45 = vst [vmem:[%s105_s1 + $0x38] sm:$0xff] %v44_v7 }

// kernel: custom-call
= control target key start
LH: loop header
LB: loop body
LE: loop exit
PB: predicated region body
PF: predicated region fallthrough
CT: control target
= control target key end

     0   :  { %2 = vsyncpa [#allocation0], 0  ;;  %s61_s0 = inlined_call_operand.hbm [shape: c64[2,8,32], index: 0, kind: input, shape index: {}]   ;;  %s62_s1 = inlined_call_operand.vmem [shape: f32[2,8,32], index: 1, kind: output, shape index: {}]  }
   0x1   :  { %s3_s8 = sshll.u32 %s62_s1, 4  ;;  %s9_s11 = scalar_lea.hbm %s61_s0, 256  ;;  %s4_s8 = int_to_ptr.vmem [resolvable:$true] %s3_s8 }
   0x2   :  { %p10_p0 = scmp.ne.s32.totalorder %s61_s0, %s9_s11  ;;  %s11_s16 = scalar_lea.hbm %s61_s0, 512 }
   0x3   :  { %p12_p1 = scmp.lt.u32.totalorder %s11_s16, %s9_s11  ;;  %p13_p2 = scmp.lt.u32.totalorder %s9_s11, %s61_s0 }
   0x5   :  { %p14_p3 = por %p13_p2, %p12_p1 }
   0x7   :  { %p15_p4 = pnand %p14_p3, %p10_p0 }
   0x9   :  { %18 = shalt.err (!%p15_p4)  }
   0xa   :  { %s19_s1 = scalar_lea.vmem %s4_s8, 256  ;;  %p24_p6 = scmp.lt.s32.totalorder %s4_s8, %s4_s8 }
   0xb   :  { %p20_p5 = scmp.ne.s32.totalorder %s4_s8, %s19_s1  ;;  %p25_p7 = scmp.lt.s32.totalorder %s19_s1, %s19_s1 }
   0xd   :  { %p26_p8 = por %p25_p7, %p24_p6 }
   0xf   :  { %p27_p9 = pnand %p26_p8, %p20_p5 }
  0x11   :  { %30 = shalt.err (!%p27_p9)  }
  0x12   :  { %6 = dma.hbm_to_vmem [thread:$0]  %s61_s0, 256, %s4_s8, [#allocation0] }
  0x13   :  { %31 = dma.done.wait [#allocation0], 256  }
  0x14   :  { %32 = vsyncadd [#allocation0], 4294967040 }
  0x15   :  { %8 = vsyncpa [#allocation0], 1 }

// kernel: custom-call.1
= control target key start
LH: loop header
LB: loop body
LE: loop exit
PB: predicated region body
PF: predicated region fallthrough
CT: control target
= control target key end

     0   :  { %s59_s0 = inlined_call_operand.hbm [shape: c64[2,8,32], index: 0, kind: input, shape index: {}]   ;;  %s60_s1 = inlined_call_operand.vmem [shape: f32[2,8,32], index: 1, kind: output, shape index: {}]  }
   0x1   :  { %s2_s8 = scalar_lea.hbm %s59_s0, 256 }
   0x2   :  { %3 = vsyncpa [#allocation0], 0  ;;  %s4_s11 = sshll.u32 %s60_s1, 4  ;;  %s34_s14 = scalar_lea.hbm %s59_s0, 512  ;;  %s5_s11 = int_to_ptr.vmem [resolvable:$true] %s4_s11 }
   0x3   :  { %p11_p0 = scmp.ne.s32.totalorder %s2_s8, %s34_s14  ;;  %p13_p1 = scmp.lt.u32.totalorder %s2_s8, %s59_s0 }
   0x4   :  { %p14_p2 = scmp.lt.u32.totalorder %s34_s14, %s34_s14  ;;  %p16_p4 = scmp.lt.u32.totalorder %s34_s14, %s2_s8 }
   0x6   :  { %p15_p3 = por %p14_p2, %p13_p1 }
   0x8   :  { %p17_p5 = por %p16_p4, %p15_p3 }
   0xa   :  { %p18_p6 = pnand %p17_p5, %p11_p0 }
   0xc   :  { %21 = shalt.err (!%p18_p6)  }
   0xd   :  { %s22_s17 = scalar_lea.vmem %s5_s11, 256  ;;  %p27_p8 = scmp.lt.s32.totalorder %s5_s11, %s5_s11 }
   0xe   :  { %p23_p7 = scmp.ne.s32.totalorder %s5_s11, %s22_s17  ;;  %p28_p9 = scmp.lt.s32.totalorder %s22_s17, %s22_s17 }
  0x10   :  { %p29_p10 = por %p28_p9, %p27_p8 }
  0x12   :  { %p30_p11 = pnand %p29_p10, %p23_p7 }
  0x14   :  { %33 = shalt.err (!%p30_p11)  }
  0x15   :  { %7 = dma.hbm_to_vmem [thread:$0]  %s2_s8, 256, %s5_s11, [#allocation0] }
  0x16   :  { %35 = dma.done.wait [#allocation0], 256  }
  0x17   :  { %36 = vsyncadd [#allocation0], 4294967040 }
  0x18   :  { %9 = vsyncpa [#allocation0], 1 }

// kernel: custom-call.6
= control target key start
LH: loop header
LB: loop body
LE: loop exit
PB: predicated region body
PF: predicated region fallthrough
CT: control target
= control target key end

     0   :  { %2 = vsyncpa [#allocation0], 0  ;;  %s61_s0 = inlined_call_operand.hbm [shape: c64[32], index: 0, kind: input, shape index: {}]   ;;  %s62_s1 = inlined_call_operand.vmem [shape: f32[32], index: 1, kind: output, shape index: {}]  }
   0x1   :  { %s3_s8 = sshll.u32 %s62_s1, 4  ;;  %s9_s11 = scalar_lea.hbm %s61_s0, 16  ;;  %s4_s8 = int_to_ptr.vmem [resolvable:$true] %s3_s8 }
   0x2   :  { %p10_p0 = scmp.ne.s32.totalorder %s61_s0, %s9_s11  ;;  %s11_s16 = scalar_lea.hbm %s61_s0, 32 }
   0x3   :  { %p12_p1 = scmp.lt.u32.totalorder %s11_s16, %s9_s11  ;;  %p13_p2 = scmp.lt.u32.totalorder %s9_s11, %s61_s0 }
   0x5   :  { %p14_p3 = por %p13_p2, %p12_p1 }
   0x7   :  { %p15_p4 = pnand %p14_p3, %p10_p0 }
   0x9   :  { %18 = shalt.err (!%p15_p4)  }
   0xa   :  { %s19_s1 = scalar_lea.vmem %s4_s8, 16  ;;  %p24_p6 = scmp.lt.s32.totalorder %s4_s8, %s4_s8 }
   0xb   :  { %p20_p5 = scmp.ne.s32.totalorder %s4_s8, %s19_s1  ;;  %p25_p7 = scmp.lt.s32.totalorder %s19_s1, %s19_s1 }
   0xd   :  { %p26_p8 = por %p25_p7, %p24_p6 }
   0xf   :  { %p27_p9 = pnand %p26_p8, %p20_p5 }
  0x11   :  { %30 = shalt.err (!%p27_p9)  }
  0x12   :  { %6 = dma.hbm_to_vmem [thread:$0]  %s61_s0, 16, %s4_s8, [#allocation0] }
  0x13   :  { %31 = dma.done.wait [#allocation0], 16  }
  0x14   :  { %32 = vsyncadd [#allocation0], 4294967280 }
  0x15   :  { %8 = vsyncpa [#allocation0], 1 }

// kernel: custom-call.7
= control target key start
LH: loop header
LB: loop body
LE: loop exit
PB: predicated region body
PF: predicated region fallthrough
CT: control target
= control target key end

     0   :  { %s59_s0 = inlined_call_operand.hbm [shape: c64[32], index: 0, kind: input, shape index: {}]   ;;  %s60_s1 = inlined_call_operand.vmem [shape: f32[32], index: 1, kind: output, shape index: {}]  }
   0x1   :  { %s2_s8 = scalar_lea.hbm %s59_s0, 16 }
   0x2   :  { %3 = vsyncpa [#allocation0], 0  ;;  %s4_s11 = sshll.u32 %s60_s1, 4  ;;  %s34_s14 = scalar_lea.hbm %s59_s0, 32  ;;  %s5_s11 = int_to_ptr.vmem [resolvable:$true] %s4_s11 }
   0x3   :  { %p11_p0 = scmp.ne.s32.totalorder %s2_s8, %s34_s14  ;;  %p13_p1 = scmp.lt.u32.totalorder %s2_s8, %s59_s0 }
   0x4   :  { %p14_p2 = scmp.lt.u32.totalorder %s34_s14, %s34_s14  ;;  %p16_p4 = scmp.lt.u32.totalorder %s34_s14, %s2_s8 }
   0x6   :  { %p15_p3 = por %p14_p2, %p13_p1 }
   0x8   :  { %p17_p5 = por %p16_p4, %p15_p3 }
   0xa   :  { %p18_p6 = pnand %p17_p5, %p11_p0 }
   0xc   :  { %21 = shalt.err (!%p18_p6)  }
   0xd   :  { %s22_s17 = scalar_lea.vmem %s5_s11, 16  ;;  %p27_p8 = scmp.lt.s32.totalorder %s5_s11, %s5_s11 }
   0xe   :  { %p23_p7 = scmp.ne.s32.totalorder %s5_s11, %s22_s17  ;;  %p28_p9 = scmp.lt.s32.totalorder %s22_s17, %s22_s17 }
  0x10   :  { %p29_p10 = por %p28_p9, %p27_p8 }
  0x12   :  { %p30_p11 = pnand %p29_p10, %p23_p7 }
  0x14   :  { %33 = shalt.err (!%p30_p11)  }
  0x15   :  { %7 = dma.hbm_to_vmem [thread:$0]  %s2_s8, 16, %s5_s11, [#allocation0] }
  0x16   :  { %35 = dma.done.wait [#allocation0], 16  }
  0x17   :  { %36 = vsyncadd [#allocation0], 4294967280 }
  0x18   :  { %9 = vsyncpa [#allocation0], 1 }

// kernel: custom-call.8
= control target key start
LH: loop header
LB: loop body
LE: loop exit
PB: predicated region body
PF: predicated region fallthrough
CT: control target
= control target key end

     0   :  { %s126_s0 = inlined_call_operand.vmem [shape: f32[2,8,32], index: 0, kind: input, shape index: {}]   ;;  %s127_s1 = inlined_call_operand.vmem [shape: f32[2,8,32], index: 1, kind: input, shape index: {}]   ;;  %s128_s2 = inlined_call_operand.hbm [shape: c64[2,8,32], index: 2, kind: output, shape index: {}]  }
   0x1   :  { %s87_s11 = scalar_lea.hbm %s128_s2, 256 }
   0x2   :  { %4 = vsyncpa [#allocation0], 0  ;;  %s5_s14 = sshll.u32 %s126_s0, 4  ;;  %s6_s14 = int_to_ptr.vmem [resolvable:$true] %s5_s14 }
   0x3   :  { %s18_s15 = scalar_lea.vmem %s6_s14, 256  ;;  %p23_p1 = scmp.lt.s32.totalorder %s6_s14, %s6_s14 }
   0x4   :  { %p19_p0 = scmp.ne.s32.totalorder %s6_s14, %s18_s15  ;;  %p24_p2 = scmp.lt.s32.totalorder %s18_s15, %s18_s15 }
   0x6   :  { %p25_p3 = por %p24_p2, %p23_p1 }
   0x8   :  { %p26_p4 = pnand %p25_p3, %p19_p0 }
   0xa   :  { %29 = shalt.err (!%p26_p4)  }
   0xb   :  { %p31_p5 = scmp.ne.s32.totalorder %s128_s2, %s87_s11  ;;  %s32_s0 = scalar_lea.hbm %s128_s2, 512 }
   0xc   :  { %p33_p6 = scmp.lt.u32.totalorder %s32_s0, %s87_s11  ;;  %p34_p7 = scmp.lt.u32.totalorder %s87_s11, %s128_s2 }
   0xe   :  { %p35_p8 = por %p34_p7, %p33_p6 }
  0x10   :  { %p36_p9 = pnand %p35_p8, %p31_p5 }
  0x12   :  { %39 = shalt.err (!%p36_p9)  }
  0x13   :  { %8 = dma.vmem_to_hbm [thread:$0]  %s6_s14, 256, %s128_s2, [#allocation0] }
  0x14   :  { %65 = dma.done.wait [#allocation0], 256  }
  0x15   :  { %66 = vsyncadd [#allocation0], 4294967040 }
  0x16   :  { %10 = vsyncpa [#allocation0], 1 }
  0x17   :  { %11 = vsyncpa [#allocation1], 0  ;;  %s12_s28 = sshll.u32 %s127_s1, 4  ;;  %s13_s28 = int_to_ptr.vmem [resolvable:$true] %s12_s28 }
  0x18   :  { %s40_s29 = scalar_lea.vmem %s13_s28, 256  ;;  %p45_p11 = scmp.lt.s32.totalorder %s13_s28, %s13_s28 }
  0x19   :  { %p41_p10 = scmp.ne.s32.totalorder %s13_s28, %s40_s29  ;;  %p46_p12 = scmp.lt.s32.totalorder %s40_s29, %s40_s29 }
  0x1b   :  { %p47_p13 = por %p46_p12, %p45_p11 }
  0x1d   :  { %p48_p0 = pnand %p47_p13, %p41_p10 }
  0x1f   :  { %51 = shalt.err (!%p48_p0)  }
  0x20   :  { %p53_p1 = scmp.ne.s32.totalorder %s87_s11, %s32_s0  ;;  %p56_p2 = scmp.lt.u32.totalorder %s32_s0, %s32_s0 }
  0x22   :  { %p57_p3 = por %p56_p2, %p34_p7 }
  0x24   :  { %p59_p4 = por %p57_p3, %p33_p6 }
  0x26   :  { %p60_p5 = pnand %p59_p4, %p53_p1 }
  0x28   :  { %63 = shalt.err (!%p60_p5)  }
  0x29   :  { %15 = dma.vmem_to_hbm [thread:$0]  %s13_s28, 256, %s87_s11, [#allocation1] }
  0x2a   :  { %67 = dma.done.wait [#allocation1], 256  }
  0x2b   :  { %68 = vsyncadd [#allocation1], 4294967040 }
  0x2c   :  { %17 = vsyncpa [#allocation1], 1 }

// kernel: attention_forward.1
= control target key start
LH: loop header
LB: loop body
LE: loop exit
PB: predicated region body
PF: predicated region fallthrough
CT: control target
= control target key end

     0   :  { %s1566_s15 = smov 0   ;;  %s1827_s0 = inlined_call_operand.vmem [shape: f32[2,8,64], index: 0, kind: input, shape index: {}]   ;;  %s1828_s1 = inlined_call_operand.vmem [shape: f32[64,128], index: 1, kind: input, shape index: {}]   ;;  %s1829_s2 = inlined_call_operand.vmem [shape: f32[128,64], index: 2, kind: input, shape index: {}]   ;;  %s1830_s3 = inlined_call_operand.vmem [shape: f32[1,64], index: 3, kind: input, shape index: {}]   ;;  %s1831_s4 = inlined_call_operand.vmem [shape: f32[2,8,64], index: 4, kind: output, shape index: {}]  }
   0x1 LB: > { %s1252_s16 = sadd.s32 4294967295, %s1528_s15   ;;  %p1256_p0 = scmp.ge.s32.totalorder %s1528_s15, 1  ;;  %s1528_s15 = sphi %s1566_s15, %s14_s15  }
   0x2   : > { %p161_p1 = scmp.lt.s32.totalorder %s1528_s15, 3 }
   0x4   : > { %p162_p2 = pnand %p1256_p0, %p161_p1 }
   0x5   : > { %v194_v0 = vld [vmem:[%s1828_s1] sm:$0xff] (!%p162_p2)  ;;  %v195_v1 = vld [vmem:[%s1828_s1 + $0x8] sm:$0xff] (!%p162_p2)  ;;  %v196_v2 = vld [vmem:[%s1828_s1 + $0x10] sm:$0xff] (!%p162_p2)  ;;  %v1530_v3 = vmov (!%p162_p2), 0.0|0.0   ;;  %vm1531_vm0 = vmmov (!%p162_p2), 0   ;;  %v1532_v6 = vmov (!%p162_p2), 0.0  }
   0x6   : > { %165 = sbr.rel (%p162_p2) target bundleno = 2302 (0x8fe), region = 36  ;;  %1431 = vmatprep.subr.bf16.mxu1 (!%p162_p2), %v1530_v3  ;;  %v1432_v4 = vpack.c.bf16 (!%p162_p2), %v195_v1, %v194_v0  ;;  %v197_v5 = vld [vmem:[%s1828_s1 + $0x18] sm:$0xff] (!%p162_p2)  ;;  %1345 = vmatprep.mubr.msk.f32.mxu1 (!%p162_p2), %vm1531_vm0, %v1532_v6  ;;  %p185_p3 = scmp.lt.s32.totalorder (!%p162_p2), %s1252_s16, 1  ;;  %v198_v8 = vld [vmem:[%s1828_s1 + $0x20] sm:$0xff] (!%p162_p2)  ;;  %v199_v9 = vld [vmem:[%s1828_s1 + $0x28] sm:$0xff] (!%p162_p2)  ;;  %vm202_vm1 = vcmask (!%p162_p2), 523264  }
   0x7   : > { %v1435_v7 = vpack.c.bf16 (!%p162_p2), %v197_v5, %v196_v2  ;;  %v1438_v10 = vpack.c.bf16 (!%p162_p2), %v199_v9, %v198_v8  ;;  %v200_v11 = vld [vmem:[%s1828_s1 + $0x30] sm:$0xff] (!%p162_p2)  ;;  %v201_v12 = vld [vmem:[%s1828_s1 + $0x38] sm:$0xff] (!%p162_p2)  ;;  %vm287_vm2 = vcmask (!%p162_p2), 261120   ;;  %s1533_s11 = smov (!%p162_p2), 112   ;;  %s1534_s12 = smov (!%p162_p2), 16   ;;  %vm285_vm3 = vcmask (!%p162_p2), 130048  }
   0x8   : > { %1433 = vmatpush3.bf16.msra.mxu1 (!%p162_p2), %v1432_v4  ;;  %v1441_v13 = vpack.c.bf16 (!%p162_p2), %v201_v12, %v200_v11  ;;  %s1535_s13 = smov (!%p162_p2), 80   ;;  %s1536_s14 = smov (!%p162_p2), 48   ;;  %vm377_vm5 = vcmask (!%p162_p2), 64512   ;;  %vm1103_vm9 = vcmask (!%p162_p2), 785408  }
   0x9   : > { %1434 = vmatprep.subr.bf16.mxu1 (!%p162_p2), %v1530_v3  ;;  %s1537_s17 = smov (!%p162_p2), 32   ;;  %s1538_s18 = smov (!%p162_p2), 64  }
   0xa   : > { %s1539_s19 = smov (!%p162_p2), 96   ;;  %s1540_s20 = smov (!%p162_p2), 8  }
   0xc   : > { %1436 = vmatpush3.bf16.msra.mxu1 (!%p162_p2), %v1435_v7 }
   0xd   : > { %s1833_s16 = smov (!%p185_p3, %s1252_s16), 1  ;;  %1437 = vmatprep.subr.bf16.mxu1 %v1530_v3 }
   0xe   : > { %s1257_s7 = sshll.u32 %s1833_s16, 3 }
   0xf   : > { %s188_s10 = scalar_lea.vmem %s1827_s0, %s1257_s7 }
  0x10   : > { %1439 = vmatpush3.bf16.msra.mxu1 %v1438_v10  ;;  %v193_v14 = vld [vmem:[%s188_s10] sm:$0xff] }
  0x11   : > { %1440 = vmatprep.subr.bf16.mxu1 %v1530_v3 }
  0x14   : > { %1442 = vmatpush3.bf16.msra.mxu1 %v1441_v13 }
  0x17   : > { %1346 = vmatmul.mubr.msk.f32.vlgmr.msra.gmra.mrb[0].mxu1 %vm202_vm1, %v193_v14 }
  0xea   : > { %v1613_v15 = vpop.f32.mrb[0].mxu1 }
  0xeb   : > { %278 = vrot.lane.b32.xlu0 %v1613_v15, %s1533_s11  ;;  %v1347_v16 = vpop.f32.mrb[1].mxu1  ;;  %1348 = vmatprep.subr.msk.mxu1 %vm287_vm2, %v1613_v15  ;;  %v276_v17 = vsub.f32 0.0, %v1613_v15 }
  0xec   : > { %1350 = vmatprep.mubr.msk.f32.mxu1 %vm287_vm2, %v1613_v15  ;;  %1349 = vmatpush3.xpose.msk.msra.mxu1 %vm287_vm2, %v1613_v15 }
  0xed   : > { %1443 = vmatprep.subr.bf16.mxu1 %v1530_v3 }
  0xef   : > { %282 = vrot.lane.b32.xlu0 %v276_v17, %s1534_s12 }
  0xf3   : > { %480 = vrot.lane.b32.xlu0 %v1613_v15, %s1535_s13 }
  0xf7   : > { %601 = vrot.lane.b32.xlu0 %v276_v17, %s1535_s13 }
  0xfb   : > { %685 = vrot.lane.b32.xlu0 %v1613_v15, %s1536_s14 }
  0xff   : > { %403 = vrot.lane.b32.xlu0 %v1613_v15, %s1534_s12 }
 0x15d   : > { %v279_v18 = vpop.permute.xlu0 %278 }
 0x161   : > { %v283_v19 = vpop.permute.xlu0 %282 }
 0x162   : > { %v286_v20 = vsel %vm285_vm3, %v279_v18, %v283_v19 }
 0x163   : > { %1351 = vmatmul.mubr.msk.f32.vlgmr.msra.gmra.mrb[2].mxu1 %vm287_vm2, %v286_v20 }
 0x164   : > { %1357 = vmatprep.mubr.msk.f32.mxu1 %vm1531_vm0, %v1532_v6 }
 0x165   : > { %v1633_v21 = vpop.permute.xlu0 %480 }
 0x169   : > { %v602_v22 = vpop.permute.xlu0 %601 }
 0x16a   : > { %v1636_v23 = vsel %vm285_vm3, %v602_v22, %v279_v18 }
 0x16d   : > { %v686_v24 = vpop.permute.xlu0 %685 }
 0x16e   : > { %v1639_v25 = vsel %vm285_vm3, %v283_v19, %v686_v24  ;;  %v688_v49 = vsel %vm285_vm3, %v686_v24, %v602_v22 }
 0x171   : > { %v404_v44 = vpop.permute.xlu0 %403 }
 0x236   : > { %v1352_v26 = vpop.f32.mrb[2].mxu1 }
 0x237   : > { %v369_v27 = vmul.f32 0.25, %v1352_v26  ;;  %v359_v28 = vpop.f32.mrb[3].mxu1 }
 0x238   : > { %v368_v29 = vmul.f32 0.25, %v359_v28 }
 0x239   : > { %v371_v30 = vmul.f32 %v369_v27, %v369_v27 }
 0x23a   : > { %v370_v31 = vmul.f32 %v368_v29, %v368_v29 }
 0x23c   : > { %v372_v32 = vadd.f32 %v371_v30, %v370_v31 }
 0x23e   : > { %vm373_vm4 = vcmp.gt.f32.partialorder %v372_v32, 0.0 }
 0x23f   : > { %v374_v33 = vsel %vm373_vm4, %v372_v32, 1.0 }
 0x240   : > { %1498 = vrsqrt.f32 %v374_v33 }
 0x24a   : > { %v1499_v34 = vpop.eup %1498 }
 0x24b   : > { %v389_v35 = vmul.f32 %v1499_v34, %v368_v29  ;;  %v376_v36 = vmul.f32 %v1499_v34, %v372_v32  ;;  %v391_v37 = vmul.f32 %v1499_v34, %v369_v27 }
 0x24d   : > { %v390_v38 = vsel %vm373_vm4, %v389_v35, 1.0  ;;  %v378_v39 = vsel %vm377_vm5, %v376_v36, -inf  ;;  %v392_v40 = vsel %vm373_vm4, %v391_v37, 0.0 }
 0x24e   : > { %379 = vmax.xlane.f32.xlu1 %v378_v39 }
 0x25f   : > { %400 = vrot.lane.b32.xlu1 %v276_v17, %s1533_s11 }
 0x263   : > { %806 = vrot.lane.b32.xlu1 %v276_v17, %s1536_s14 }
 0x2db   : > { %v380_v41 = vpop.xlane.xlu1 %379 }
 0x2dc   : > { %v381_v42 = vsub.f32 %v376_v36, %v380_v41 }
 0x2de   : > { %v382_v43 = vmul.f32 1.442695, %v381_v42 }
 0x2df   : > { %v401_v45 = vpop.permute.xlu1 %400 }
 0x2e0   : > { %1500 = vpow2.f32 %v382_v43  ;;  %v406_v46 = vsel %vm285_vm3, %v401_v45, %v404_v44  ;;  %v483_v47 = vsel %vm285_vm3, %v1633_v21, %v401_v45 }
 0x2e1   : > { %v1444_v48 = vpack.c.bf16 %v406_v46, %v1613_v15  ;;  %485 = vrot.lane.b32.xlu1 %v483_v47, %s1537_s17 }
 0x2e3   : > { %1445 = vmatpush3.bf16.msra.mxu1 %v1444_v48  ;;  %v1650_v50 = vpop.permute.xlu1 %806 }
 0x2e4   : > { %v890_v51 = vsel %vm285_vm3, %v404_v44, %v1650_v50 }
 0x2e5   : > { %690 = vrot.lane.b32.xlu1 %v688_v49, %s1538_s18 }
 0x2e9   : > { %892 = vrot.lane.b32.xlu1 %v890_v51, %s1539_s19 }
 0x2ea   : > { %v1501_v52 = vpop.eup %1500 }
 0x2eb   : > { %v384_v53 = vsel %vm377_vm5, %v1501_v52, 0.0 }
 0x2ec   : > { %385 = vadd.xlane.f32.xlu0 %v384_v53 }
 0x2ed   : > { %487 = vrot.lane.b32.xlu1 %v1613_v15, %s1539_s19 }
 0x302   : > { %894 = vrot.lane.b32.xlu0 %v1613_v15, %s1537_s17 }
 0x353   : > { %v486_v54 = vpop.permute.xlu1 %485 }
 0x357   : > { %v691_v55 = vpop.permute.xlu1 %690 }
 0x35b   : > { %v893_v56 = vpop.permute.xlu1 %892 }
 0x35f   : > { %v1661_v57 = vpop.permute.xlu1 %487 }
 0x360   : > { %1360 = vmatprep.subr.msk.mxu1 %vm287_vm2, %v1661_v57 }
 0x379   : > { %v386_v58 = vpop.xlane.xlu0 %385 }
 0x37a   : > { %1502 = vrcp.f32 %v386_v58 }
 0x37d   : > { %v1687_v4 = vpop.permute.xlu0 %894 }
 0x384   : > { %v1503_v59 = vpop.eup %1502 }
 0x385   : > { %v388_v60 = vmul.f32 %v1503_v59, %v1501_v52 }
 0x387   : > { %v394_v61 = vmul.f32 %v392_v40, %v388_v60  ;;  %v393_v62 = vmul.f32 %v390_v38, %v388_v60 }
 0x389   : > { %396 = vrot.lane.b32.xlu1 %v394_v61, %s1540_s20 }
 0x38d   : > { %489 = vrot.lane.b32.xlu1 %v486_v54, %s1539_s19 }
 0x391   : > { %692 = vrot.lane.b32.xlu1 %v1613_v15, %s1538_s18 }
 0x395   : > { %694 = vrot.lane.b32.xlu1 %v691_v55, %s1538_s18 }
 0x399   : > { %896 = vrot.lane.b32.xlu1 %v893_v56, %s1537_s17 }
 0x3fb   : > { %v397_v63 = vpop.permute.xlu1 %396 }
 0x3fc   : > { %v399_v0 = vsel %vm377_vm5, %v393_v62, %v397_v63 }
 0x3fd   : > { %1358 = vmatmul.mubr.msk.f32.vlgmr.msra.gmra.mrb[4].mxu1 %vm285_vm3, %v399_v0 }
 0x3fe   : > { %1361 = vmatpush3.xpose.msk.msra.mxu1 %vm287_vm2, %v1661_v57  ;;  %1362 = vmatprep.mubr.msk.f32.mxu1 %vm287_vm2, %v1661_v57 }
 0x3ff   : > { %v490_v1 = vpop.permute.xlu1 %489  ;;  %1446 = vmatprep.subr.bf16.mxu1 %v1530_v3 }
 0x401   : > { %1363 = vmatmul.mubr.msk.f32.vlgmr.msra.gmra.mrb[6].mxu1 %vm287_vm2, %v490_v1 }
 0x402   : > { %1369 = vmatprep.mubr.msk.f32.mxu1 %vm1531_vm0, %v1532_v6 }
 0x403   : > { %v1681_v2 = vpop.permute.xlu1 %692 }
 0x404   : > { %1372 = vmatprep.subr.msk.mxu0 %vm287_vm2, %v1681_v2  ;;  %1374 = vmatprep.mubr.msk.f32.mxu0 %vm287_vm2, %v1681_v2 }
 0x405   : > { %1373 = vmatpush3.xpose.msk.msra.mxu0 %vm287_vm2, %v1681_v2 }
 0x406   : > { %1384 = vmatprep.subr.msk.mxu0 %vm287_vm2, %v1687_v4 }
 0x407   : > { %v695_v5 = vpop.permute.xlu1 %694 }
 0x408   : > { %1375 = vmatmul.mubr.msk.f32.vlgmr.msra.gmra.mrb[0].mxu0 %vm287_vm2, %v695_v5 }
 0x409   : > { %1385 = vmatpush3.xpose.msk.msra.mxu0 %vm287_vm2, %v1687_v4  ;;  %1386 = vmatprep.mubr.msk.f32.mxu0 %vm287_vm2, %v1687_v4 }
 0x40a   : > { %1455 = vmatprep.subr.bf16.mxu0 %v1530_v3 }
 0x40b   : > { %v897_v7 = vpop.permute.xlu1 %896 }
 0x40c   : > { %1387 = vmatmul.mubr.msk.f32.vlgmr.msra.gmra.mrb[2].mxu0 %vm287_vm2, %v897_v7 }
 0x40d   : > { %1428 = vmatprep.mubr.msk.f32.mxu0 %vm1531_vm0, %v1532_v6 }
 0x4d0   : > { %v1702_v8 = vpop.f32.mrb[4].mxu1 }
 0x4d1   : > { %v1359_v9 = vpop.f32.mrb[5].mxu1 }
 0x4d4   : > { %v1364_v10 = vpop.f32.mrb[6].mxu1 }
 0x4d5   : > { %v571_v11 = vmul.f32 0.25, %v1364_v10  ;;  %v561_v12 = vpop.f32.mrb[7].mxu1 }
 0x4d6   : > { %v570_v13 = vmul.f32 0.25, %v561_v12  ;;  %v809_v12 = vsel %vm285_vm3, %v1650_v50, %v1633_v21 }
 0x4d7   : > { %v573_v14 = vmul.f32 %v571_v11, %v571_v11 }
 0x4d8   : > { %v572_v15 = vmul.f32 %v570_v13, %v570_v13 }
 0x4da   : > { %v574_v16 = vadd.f32 %v573_v14, %v572_v15 }
 0x4db   : > { %v1376_v17 = vpop.f32.mrb[0].mxu0 }
 0x4dc   : > { %vm575_vm6 = vcmp.gt.f32.partialorder %v574_v16, 0.0  ;;  %v776_v18 = vmul.f32 0.25, %v1376_v17  ;;  %v766_v19 = vpop.f32.mrb[1].mxu0 }
 0x4dd   : > { %v576_v20 = vsel %vm575_vm6, %v574_v16, 1.0  ;;  %v775_v22 = vmul.f32 0.25, %v766_v19 }
 0x4de   : > { %1504 = vrsqrt.f32 %v576_v20  ;;  %v778_v24 = vmul.f32 %v776_v18, %v776_v18 }
 0x4df   : > { %v777_v26 = vmul.f32 %v775_v22, %v775_v22  ;;  %v1388_v27 = vpop.f32.mrb[2].mxu0 }
 0x4e0   : > { %v978_v28 = vmul.f32 0.25, %v1388_v27  ;;  %v968_v29 = vpop.f32.mrb[3].mxu0 }
 0x4e1   : > { %v779_v30 = vadd.f32 %v778_v24, %v777_v26  ;;  %v977_v31 = vmul.f32 0.25, %v968_v29 }
 0x4e2   : > { %v980_v32 = vmul.f32 %v978_v28, %v978_v28 }
 0x4e3   : > { %vm780_vm7 = vcmp.gt.f32.partialorder %v779_v30, 0.0  ;;  %v979_v33 = vmul.f32 %v977_v31, %v977_v31 }
 0x4e4   : > { %v781_v34 = vsel %vm780_vm7, %v779_v30, 1.0 }
 0x4e5   : > { %1506 = vrsqrt.f32 %v781_v34  ;;  %v981_v35 = vadd.f32 %v980_v32, %v979_v33 }
 0x4e7   : > { %vm982_vm8 = vcmp.gt.f32.partialorder %v981_v35, 0.0 }
 0x4e8   : > { %v1505_v36 = vpop.eup %1504  ;;  %v983_v37 = vsel %vm982_vm8, %v981_v35, 1.0 }
 0x4e9   : > { %v590_v38 = vmul.f32 %v1505_v36, %v570_v13  ;;  %1508 = vrsqrt.f32 %v983_v37  ;;  %v578_v39 = vmul.f32 %v1505_v36, %v574_v16  ;;  %v592_v40 = vmul.f32 %v1505_v36, %v571_v11 }
 0x4eb   : > { %v1708_v41 = vsel %vm575_vm6, %v590_v38, 1.0  ;;  %v579_v42 = vsel %vm377_vm5, %v578_v39, -inf  ;;  %v1712_v43 = vsel %vm575_vm6, %v592_v40, 0.0 }
 0x4ec   : > { %580 = vmax.xlane.f32.xlu1 %v579_v42 }
 0x4ef   : > { %v1507_v44 = vpop.eup %1506 }
 0x4f0   : > { %v795_v45 = vmul.f32 %v1507_v44, %v775_v22  ;;  %v783_v46 = vmul.f32 %v1507_v44, %v779_v30  ;;  %v797_v47 = vmul.f32 %v1507_v44, %v776_v18  ;;  %v1105_v44 = vld [vmem:[%s1829_s2] sm:$0xff] }
 0x4f2   : > { %v796_v48 = vsel %vm780_vm7, %v795_v45, 1.0  ;;  %v784_v49 = vsel %vm377_vm5, %v783_v46, -inf  ;;  %v798_v51 = vsel %vm780_vm7, %v797_v47, 0.0  ;;  %v1107_v45 = vld [vmem:[%s1829_s2 + $0x10] sm:$0xff] }
 0x4f3   : > { %v1509_v52 = vpop.eup %1508  ;;  %785 = vmax.xlane.f32.xlu0 %v784_v49  ;;  %v1110_v49 = vld [vmem:[%s1829_s2 + $0x28] sm:$0xff] }
 0x4f4   : > { %v997_v53 = vmul.f32 %v1509_v52, %v977_v31  ;;  %v985_v54 = vmul.f32 %v1509_v52, %v981_v35  ;;  %v999_v55 = vmul.f32 %v1509_v52, %v978_v28  ;;  %v1111_v52 = vld [vmem:[%s1829_s2 + $0x30] sm:$0xff] }
 0x4f6   : > { %v998_v56 = vsel %vm982_vm8, %v997_v53, 1.0  ;;  %v986_v58 = vsel %vm377_vm5, %v985_v54, -inf  ;;  %v1000_v59 = vsel %vm982_vm8, %v999_v55, 0.0  ;;  %v1112_v53 = vld [vmem:[%s1829_s2 + $0x38] sm:$0xff]  ;;  %v1113_v55 = vld [vmem:[%s1829_s2 + $0x40] sm:$0xff] }
 0x4f7   : > { %987 = vmax.xlane.f32.xlu1 %v986_v58 }
 0x579   : > { %v581_v60 = vpop.xlane.xlu1 %580 }
 0x57a   : > { %v582_v13 = vsub.f32 %v578_v39, %v581_v60  ;;  %v1116_v60 = vld [vmem:[%s1829_s2 + $0x58] sm:$0xff] }
 0x57c   : > { %v583_v14 = vmul.f32 1.442695, %v582_v13 }
 0x580   : > { %v786_v61 = vpop.xlane.xlu0 %785 }
 0x581   : > { %v787_v62 = vsub.f32 %v783_v46, %v786_v61 }
 0x583   : > { %v788_v63 = vmul.f32 1.442695, %v787_v62  ;;  %v1117_v62 = vld [vmem:[%s1829_s2 + $0x60] sm:$0xff] }
 0x584   : > { %v988_v0 = vpop.xlane.xlu1 %987 }
 0x585   : > { %1510 = vpow2.f32 %v788_v63  ;;  %v989_v1 = vsub.f32 %v985_v54, %v988_v0  ;;  %v1465_v54 = vpack.c.bf16 %v1112_v53, %v1111_v52  ;;  %v1118_v63 = vld [vmem:[%s1829_s2 + $0x68] sm:$0xff] }
 0x586   : > { %v1474_v0 = vpack.c.bf16 %v1118_v63, %v1117_v62 }
 0x587   : > { %v990_v5 = vmul.f32 1.442695, %v989_v1  ;;  %v1119_v1 = vld [vmem:[%s1829_s2 + $0x70] sm:$0xff] }
 0x589   : > { %1512 = vpow2.f32 %v990_v5  ;;  %v1120_v5 = vld [vmem:[%s1829_s2 + $0x78] sm:$0xff] }
 0x58a   : > { %1514 = vpow2.f32 %v583_v14 }
 0x58f   : > { %v1511_v7 = vpop.eup %1510 }
 0x590   : > { %v790_v9 = vsel %vm377_vm5, %v1511_v7, 0.0 }
 0x591   : > { %791 = vadd.xlane.f32.xlu1 %v790_v9 }
 0x593   : > { %v1513_v10 = vpop.eup %1512 }
 0x594   : > { %v992_v11 = vsel %vm377_vm5, %v1513_v10, 0.0  ;;  %v1515_v15 = vpop.eup %1514 }
 0x595   : > { %993 = vadd.xlane.f32.xlu0 %v992_v11  ;;  %v585_v16 = vsel %vm377_vm5, %v1515_v15, 0.0 }
 0x5a2   : > { %606 = vrot.lane.b32.xlu1 %v1636_v23, %s1537_s17 }
 0x5ab   : > { %811 = vrot.lane.b32.xlu0 %v809_v12, %s1538_s18 }
 0x5c6   : > { %586 = vadd.xlane.f32.xlu1 %v585_v16 }
 0x5d7   : > { %1010 = vrot.lane.b32.xlu1 %v1639_v25, %s1539_s19 }
 0x61e   : > { %v792_v17 = vpop.xlane.xlu1 %791 }
 0x61f   : > { %1516 = vrcp.f32 %v792_v17 }
 0x622   : > { %v994_v18 = vpop.xlane.xlu0 %993  ;;  %v607_v23 = vpop.permute.xlu1 %606 }
 0x623   : > { %1518 = vrcp.f32 %v994_v18  ;;  %608 = vrot.lane.b32.xlu1 %v607_v23, %s1539_s19 }
 0x626   : > { %v812_v21 = vpop.permute.xlu0 %811 }
 0x627   : > { %813 = vrot.lane.b32.xlu1 %v812_v21, %s1538_s18  ;;  %v1276_v21 = vld [vmem:[%s1830_s3] ss:$0 sm:$0xff] }
 0x629   : > { %v1517_v50 = vpop.eup %1516 }
 0x62a   : > { %v794_v19 = vmul.f32 %v1517_v50, %v1511_v7  ;;  %v1477_v7 = vpack.c.bf16 %v1120_v5, %v1119_v1 }
 0x62c   : > { %v799_v20 = vmul.f32 %v796_v48, %v794_v19  ;;  %v800_v32 = vmul.f32 %v798_v51, %v794_v19  ;;  %v1109_v48 = vld [vmem:[%s1829_s2 + $0x20] sm:$0xff] }
 0x62d   : > { %v1519_v22 = vpop.eup %1518  ;;  %v1462_v51 = vpack.c.bf16 %v1110_v49, %v1109_v48 }
 0x62e   : > { %v996_v24 = vmul.f32 %v1519_v22, %v1513_v10 }
 0x630   : > { %v1001_v26 = vmul.f32 %v998_v56, %v996_v24  ;;  %v1002_v33 = vmul.f32 %v1000_v59, %v996_v24  ;;  %v1114_v56 = vld [vmem:[%s1829_s2 + $0x48] sm:$0xff]  ;;  %v1115_v59 = vld [vmem:[%s1829_s2 + $0x50] sm:$0xff] }
 0x631   : > { %v1468_v58 = vpack.c.bf16 %v1114_v56, %v1113_v55  ;;  %v1471_v61 = vpack.c.bf16 %v1116_v60, %v1115_v59 }
 0x653   : > { %v587_v27 = vpop.xlane.xlu1 %586 }
 0x654   : > { %1520 = vrcp.f32 %v587_v27 }
 0x657   : > { %v1011_v28 = vpop.permute.xlu1 %1010 }
 0x658   : > { %1012 = vrot.lane.b32.xlu1 %v1011_v28, %s1537_s17 }
 0x65e   : > { %v1521_v25 = vpop.eup %1520 }
 0x65f   : > { %v589_v29 = vmul.f32 %v1521_v25, %v1515_v15 }
 0x661   : > { %v595_v30 = vmul.f32 %v1712_v43, %v589_v29  ;;  %v594_v31 = vmul.f32 %v1708_v41, %v589_v29 }
 0x663   : > { %597 = vrot.lane.b32.xlu0 %v595_v30, %s1540_s20 }
 0x667   : > { %802 = vrot.lane.b32.xlu0 %v800_v32, %s1540_s20 }
 0x66b   : > { %1004 = vrot.lane.b32.xlu0 %v1002_v33, %s1540_s20 }
 0x695   : > { %v609_v34 = vpop.permute.xlu1 %608 }
 0x696   : > { %v1447_v35 = vpack.c.bf16 %v609_v34, %v1661_v57 }
 0x698   : > { %1448 = vmatpush3.bf16.msra.mxu1 %v1447_v35 }
 0x699   : > { %1449 = vmatprep.subr.bf16.mxu1 %v1530_v3  ;;  %v814_v36 = vpop.permute.xlu1 %813 }
 0x69a   : > { %v1450_v38 = vpack.c.bf16 %v814_v36, %v1681_v2 }
 0x6ca   : > { %v1013_v40 = vpop.permute.xlu1 %1012 }
 0x6cb   : > { %v1453_v57 = vpack.c.bf16 %v1013_v40, %v1687_v4  ;;  %v1106_v4 = vld [vmem:[%s1829_s2 + $0x8] sm:$0xff] }
 0x6cc   : > { %v1456_v46 = vpack.c.bf16 %v1106_v4, %v1105_v44 }
 0x6ce   : > { %1457 = vmatpush3.bf16.msra.mxu0 %v1456_v46 }
 0x6cf   : > { %1458 = vmatprep.subr.bf16.mxu0 %v1530_v3 }
 0x6d5   : > { %v598_v37 = vpop.permute.xlu0 %597 }
 0x6d6   : > { %v600_v39 = vsel %vm377_vm5, %v594_v31, %v598_v37 }
 0x6d7   : > { %1370 = vmatmul.mubr.msk.f32.vlgmr.msra.gmra.mrb[8].mxu1 %vm285_vm3, %v600_v39 }
 0x6d8   : > { %1451 = vmatpush3.bf16.msra.mxu1 %v1450_v38  ;;  %1381 = vmatprep.mubr.msk.f32.mxu1 %vm1531_vm0, %v1532_v6 }
 0x6d9   : > { %v803_v41 = vpop.permute.xlu0 %802  ;;  %1452 = vmatprep.subr.bf16.mxu1 %v1530_v3 }
 0x6da   : > { %v805_v42 = vsel %vm377_vm5, %v799_v20, %v803_v41 }
 0x6db   : > { %1382 = vmatmul.mubr.msk.f32.vlgmr.msra.gmra.mrb[10].mxu1 %vm285_vm3, %v805_v42 }
 0x6dc   : > { %1454 = vmatpush3.bf16.msra.mxu1 %v1453_v57  ;;  %1393 = vmatprep.mubr.msk.f32.mxu1 %vm1531_vm0, %v1532_v6  ;;  %v1108_v6 = vld [vmem:[%s1829_s2 + $0x18] sm:$0xff] }
 0x6dd   : > { %v1005_v2 = vpop.permute.xlu0 %1004  ;;  %v1459_v47 = vpack.c.bf16 %v1108_v6, %v1107_v45 }
 0x6de   : > { %v1007_v43 = vsel %vm377_vm5, %v1001_v26, %v1005_v2 }
 0x6df   : > { %1394 = vmatmul.mubr.msk.f32.vlgmr.msra.gmra.mrb[12].mxu1 %vm285_vm3, %v1007_v43  ;;  %1460 = vmatpush3.bf16.msra.mxu0 %v1459_v47 }
 0x6e0   : > { %1461 = vmatprep.subr.bf16.mxu0 %v1530_v3 }
 0x6e3   : > { %1463 = vmatpush3.bf16.msra.mxu0 %v1462_v51 }
 0x6e4   : > { %1464 = vmatprep.subr.bf16.mxu0 %v1530_v3 }
 0x6e7   : > { %1466 = vmatpush3.bf16.msra.mxu0 %v1465_v54 }
 0x6e8   : > { %1467 = vmatprep.subr.bf16.mxu0 %v1530_v3 }
 0x6eb   : > { %1469 = vmatpush3.bf16.msra.mxu0 %v1468_v58 }
 0x6ec   : > { %1470 = vmatprep.subr.bf16.mxu0 %v1530_v3 }
 0x6ef   : > { %1472 = vmatpush3.bf16.msra.mxu0 %v1471_v61 }
 0x6f0   : > { %1473 = vmatprep.subr.bf16.mxu0 %v1530_v3 }
 0x6f3   : > { %1475 = vmatpush3.bf16.msra.mxu0 %v1474_v0 }
 0x6f4   : > { %1476 = vmatprep.subr.bf16.mxu0 %v1530_v3 }
 0x6f7   : > { %1478 = vmatpush3.bf16.msra.mxu0 %v1477_v7 }
 0x7aa   : > { %v681_v9 = vpop.f32.mrb[8].mxu1 }
 0x7ab   : > { %1090 = vrot.lane.b32.xlu1 %v681_v9, %s1537_s17  ;;  %v1371_v10 = vpop.f32.mrb[9].mxu1 }
 0x7ae   : > { %v886_v11 = vpop.f32.mrb[10].mxu1 }
 0x7af   : > { %1094 = vrot.lane.b32.xlu0 %v886_v11, %s1538_s18  ;;  %v1383_v12 = vpop.f32.mrb[11].mxu1 }
 0x7b2   : > { %v1085_v3 = vpop.f32.mrb[12].mxu1 }
 0x7b3   : > { %1098 = vrot.lane.b32.xlu1 %v1085_v3, %s1539_s19  ;;  %v1395_v13 = vpop.f32.mrb[13].mxu1  ;;  %s192_s19 = scalar_lea.vmem %s1831_s4, %s1257_s7 }
 0x81d   : > { %v1091_v14 = vpop.permute.xlu1 %1090 }
 0x81e   : > { %v1101_v16 = vsel %vm287_vm2, %v1702_v8, %v1091_v14 }
 0x821   : > { %v1095_v15 = vpop.permute.xlu0 %1094 }
 0x822   : > { %v1102_v17 = vsel %vm202_vm1, %v1101_v16, %v1095_v15 }
 0x825   : > { %v1099_v18 = vpop.permute.xlu1 %1098 }
 0x826   : > { %v1104_v23 = vsel %vm1103_vm9, %v1102_v17, %v1099_v18 }
 0x827   : > { %1429 = vmatmul.mubr.f32.vlgmr.msra.gmra.mrb[4].mxu0 %v1104_v23 }
 0x8fa   : > { %v1194_v50 = vpop.f32.mrb[4].mxu0 }
 0x8fb   : > { %v1195_v19 = vadd.f32 %v1276_v21, %v1194_v50  ;;  %v1430_v20 = vpop.f32.mrb[5].mxu0 }
 0x8fd   : > { %1198 = vst.msk [vmem:[%s192_s19] sm:$0xff] %vm202_vm1, %v1195_v19 }
 0x8fe PF: > { %s14_s15 = sadd.s32 1, %s1528_s15  }
 0x8ff   : > { %p11_p4 = scmp.ge.s32.totalorder %s14_s15, 4  }
 0x901   :  { %13 = sbr.rel (!%p11_p4) target bundleno = 1 (0x1), region = 66 }

</bundles_post_ra>
